<compile_context>
chip_gen: v7x
topology: tpu7x:2x2x1
jax: 0.10.0
libtpu: 0.0.40
codegen_flags: <defaults>
</compile_context>

<pallas_src>
import functools

import jax
import jax.numpy as jnp
from jax.experimental import pallas as pl
from jax.experimental.pallas import tpu as pltpu


def _pick_tile(n: int, target: int, align: int) -> int:
    """Largest divisor of n that is <= target and a multiple of `align`.
    Falls back to n (full extent, always a legal Pallas block)."""
    if n <= target:
        return n
    t = target - (target % align)
    while t >= align:
        if n % t == 0:
            return t
        t -= align
    return n


def _gcn_kernel(adj_ref, xf_ref, *rest, activation, nk):
    # Grid = (m: output node-row tiles [parallel], k: contraction tiles [arbitrary]).
    if nk == 1:
        refs, h_acc = rest, None
    else:
        refs, h_acc = rest[:-1], rest[-1]

    if activation == "relu":
        w_ref, b_ref, o_ref = refs
    else:  # glu
        wa_ref, wg_ref, ba_ref, bg_ref, o_ref = refs

    # Graph mixing on the MXU: [tm, tk] @ [tk, B*C_in], f32 accumulation.
    partial = jnp.dot(
        adj_ref[...], xf_ref[...], preferred_element_type=jnp.float32
    )

    def epilogue(h_f32):
        if activation == "relu":
            h = h_f32.astype(w_ref.dtype)
            z = jnp.dot(h, w_ref[...], preferred_element_type=jnp.float32)
            z = z + b_ref[...]
            out = jnp.maximum(z, 0.0)
        else:
            # Two lane-aligned matmuls; no mid-lane slice of a fused output.
            h = h_f32.astype(wa_ref.dtype)
            za = jnp.dot(h, wa_ref[...], preferred_element_type=jnp.float32)
            za = za + ba_ref[...]
            zg = jnp.dot(h, wg_ref[...], preferred_element_type=jnp.float32)
            zg = zg + bg_ref[...]
            out = za * jax.nn.sigmoid(zg)   # sigmoid -> EUP slot
        o_ref[...] = out.astype(o_ref.dtype)

    if nk == 1:
        # Single contraction step: no scratch traffic at all.
        epilogue(partial)
    else:
        k = pl.program_id(1)

        @pl.when(k == 0)
        def _():
            h_acc[...] = partial            # overwrite: no zero-init pass

        @pl.when(jnp.logical_and(k > 0, k < nk - 1))
        def _():
            h_acc[...] += partial

        @pl.when(k == nk - 1)
        def _():
            # Add the last partial in registers; fuse linear + bias + act.
            epilogue(h_acc[...] + partial)


def graph_convolution(
    x,
    adjacency_matrix,
    weight,
    bias,
    *,
    activation,
    out_channels,
    compute_dtype=jnp.bfloat16,
    row_tile=256,
    k_tile=512,
):
    """x: [B, N, C_in], adjacency_matrix: [N, N], weight: [C_in, C_lin],
    bias: [C_lin].  Returns [B, N, C_out]."""
    B, N, C_in = x.shape
    C_lin = weight.shape[1]
    assert weight.shape[0] == C_in and bias.shape == (C_lin,)
    if activation == "glu":
        assert C_lin == 2 * out_channels
    else:
        assert activation == "relu" and C_lin == out_channels

    # ---- lane-dense layout: fold batch into the lane axis -------------------
    # Xf[m, b*C_in + c] = x[b, m, c]   (wrapper-side layout plumbing, one HBM
    # pass; negligible vs the O(N^2) graph matmul).
    xf = jnp.transpose(x, (1, 0, 2)).reshape(N, B * C_in).astype(compute_dtype)
    adj = adjacency_matrix.astype(compute_dtype)

    # Block-diagonal weight so the fused epilogue stays a single lane-dense 2D
    # matmul against the folded layout.  Fine for the small channel counts /
    # moderate batch STFGNN uses; for very large B the batch should move to a
    # grid axis instead (B^2 weight blowup otherwise).
    eye_b = jnp.eye(B, dtype=weight.dtype)

    def block_diag(w):  # [C_in, K] -> [B*C_in, B*K]
        return jnp.kron(eye_b, w).astype(compute_dtype)

    # ---- tiling --------------------------------------------------------------
    tm = _pick_tile(N, row_tile, 8)    # second-minor: multiple of 8 (or full N)
    tk = _pick_tile(N, k_tile, 128)    # minor/contraction: multiple of 128 (or full N)
    nm, nk = N // tm, N // tk
    grid = (nm, nk)

    adj_spec = pl.BlockSpec((tm, tk), lambda m, k: (m, k))
    xf_spec = pl.BlockSpec((tk, B * C_in), lambda m, k: (k, 0))
    out_spec = pl.BlockSpec((tm, B * out_channels), lambda m, k: (m, 0))

    def full_spec(shape):
        # Same block for every grid point -> stays VMEM-resident, no re-DMA.
        return pl.BlockSpec(shape, lambda m, k: (0, 0))

    if activation == "relu":
        w_blk = block_diag(weight)                                   # [B*C_in, B*C_out]
        b_f = jnp.tile(bias, B).reshape(1, B * out_channels).astype(jnp.float32)
        operands = (adj, xf, w_blk, b_f)
        in_specs = [
            adj_spec,
            xf_spec,
            full_spec((B * C_in, B * out_channels)),
            full_spec((1, B * out_channels)),
        ]
        epilogue_flops = 2 * N * (B * C_in) * (B * out_channels)
        transcendentals = 0
    else:  # glu: split weight/bias in the wrapper -> two lane-aligned matmuls
        w_a, w_g = weight[:, :out_channels], weight[:, out_channels:]
        b_a, b_g = bias[:out_channels], bias[out_channels:]
        wa_blk, wg_blk = block_diag(w_a), block_diag(w_g)
        ba_f = jnp.tile(b_a, B).reshape(1, B * out_channels).astype(jnp.float32)
        bg_f = jnp.tile(b_g, B).reshape(1, B * out_channels).astype(jnp.float32)
        operands = (adj, xf, wa_blk, wg_blk, ba_f, bg_f)
        in_specs = [
            adj_spec,
            xf_spec,
            full_spec((B * C_in, B * out_channels)),
            full_spec((B * C_in, B * out_channels)),
            full_spec((1, B * out_channels)),
            full_spec((1, B * out_channels)),
        ]
        epilogue_flops = 4 * N * (B * C_in) * (B * out_channels)
        transcendentals = N * B * out_channels

    # Scratch only needed when the contraction spans more than one k-tile.
    scratch_shapes = [] if nk == 1 else [pltpu.VMEM((tm, B * C_in), jnp.float32)]

    kernel = functools.partial(_gcn_kernel, activation=activation, nk=nk)

    out_bytes = N * B * out_channels * jnp.dtype(x.dtype).itemsize
    cost = pl.CostEstimate(
        flops=int(2 * N * N * B * C_in + epilogue_flops),
        transcendentals=int(transcendentals),
        bytes_accessed=int(sum(int(o.nbytes) for o in operands) + out_bytes),
    )

    of = pl.pallas_call(
        kernel,
        out_shape=jax.ShapeDtypeStruct((N, B * out_channels), x.dtype),
        grid_spec=pltpu.PrefetchScalarGridSpec(
            num_scalar_prefetch=0,
            grid=grid,
            in_specs=in_specs,
            out_specs=out_spec,
            scratch_shapes=scratch_shapes,
        ),
        compiler_params=pltpu.CompilerParams(
            dimension_semantics=("parallel", "arbitrary"),
            vmem_limit_bytes=64 * 1024 * 1024,
        ),
        cost_estimate=cost,
    )(*operands)

    # [N, B*C_out] -> [B, N, C_out]
    return jnp.transpose(of.reshape(N, B, out_channels), (1, 0, 2))


def _reference(x, adj, weight, bias, activation, out_channels):
    h = jnp.einsum("nm,bmc->bnc", adj, x)
    z = jnp.einsum("bnc,ck->bnk", h, weight) + bias
    if activation == "relu":
        return jnp.maximum(z, 0.0)
    a, g = z[..., :out_channels], z[..., out_channels:]
    return a * jax.nn.sigmoid(g)


if __name__ == "__main__":
    key = jax.random.PRNGKey(0)
    B, N, C_in, C_out = 2, 16, 8, 32

    k_x, k_adj, k_wr, k_br, k_wg, k_bg = jax.random.split(key, 6)
    x = jax.random.normal(k_x, (B, N, C_in), dtype=jnp.float32)
    adj = jax.random.normal(k_adj, (N, N), dtype=jnp.float32)

    # Deterministic Linear-style init (uniform bound 1/sqrt(fan_in)).
    bound = 1.0 / (C_in ** 0.5)
    w_relu = jax.random.uniform(k_wr, (C_in, C_out), minval=-bound, maxval=bound,
                                dtype=jnp.float32)
    b_relu = jax.random.uniform(k_br, (C_out,), minval=-bound, maxval=bound,
                                dtype=jnp.float32)
    w_glu = jax.random.uniform(k_wg, (C_in, 2 * C_out), minval=-bound, maxval=bound,
                               dtype=jnp.float32)
    b_glu = jax.random.uniform(k_bg, (2 * C_out,), minval=-bound, maxval=bound,
                               dtype=jnp.float32)

    ref_relu = _reference(x, adj, w_relu, b_relu, "relu", C_out)
    ref_glu = _reference(x, adj, w_glu, b_glu, "glu", C_out)

    # Exact-semantics check: f32 compute path.
    out_relu_f32 = graph_convolution(x, adj, w_relu, b_relu, activation="relu",
                                     out_channels=C_out, compute_dtype=jnp.float32)
    out_glu_f32 = graph_convolution(x, adj, w_glu, b_glu, activation="glu",
                                    out_channels=C_out, compute_dtype=jnp.float32)

    # Performance path: bf16 MXU operands, f32 accumulation.
    out_relu_bf16 = graph_convolution(x, adj, w_relu, b_relu, activation="relu",
                                      out_channels=C_out)
    out_glu_bf16 = graph_convolution(x, adj, w_glu, b_glu, activation="glu",
                                     out_channels=C_out)

    jax.block_until_ready((out_relu_f32, out_glu_f32, out_relu_bf16, out_glu_bf16))

    assert out_relu_f32.shape == (B, N, C_out)
    assert out_glu_f32.shape == (B, N, C_out)
    assert jnp.allclose(out_relu_f32, ref_relu, atol=1e-5, rtol=1e-5)
    assert jnp.allclose(out_glu_f32, ref_glu, atol=1e-5, rtol=1e-5)

    # bf16 path: loose tolerance vs the pure-f32 reference.
    def rel_err(a, b):
        return float(jnp.max(jnp.abs(a - b)) / (jnp.max(jnp.abs(b)) + 1e-6))

    assert rel_err(out_relu_bf16, ref_relu) < 5e-2
    assert rel_err(out_glu_bf16, ref_glu) < 5e-2

    print("KERNEL_OK")
</pallas_src>

<mosaic_0001>
module attributes {stable_mosaic.version = 11 : i64} {
  func.func @_gcn_kernel(%arg0: i32, %arg1: i32, %arg2: memref<16x16xf32, #tpu.memory_space<vmem>>, %arg3: memref<16x16xf32, #tpu.memory_space<vmem>>, %arg4: memref<16x64xf32, #tpu.memory_space<vmem>>, %arg5: memref<1x64xf32, #tpu.memory_space<vmem>>, %arg6: memref<16x64xf32, #tpu.memory_space<vmem>>) attributes {dimension_semantics = [#tpu.dimension_semantics<parallel>, #tpu.dimension_semantics<arbitrary>], iteration_bounds = array<i64: 1, 1>, scalar_prefetch = 0 : i64, scratch_operands = 0 : i64, tpu.core_type = #tpu.core_type<tc>, window_params = [{transform_indices = @transform_0, window_bounds = array<i64: 16, 16>}, {transform_indices = @transform_1, window_bounds = array<i64: 16, 16>}, {pipeline_mode = #tpu.pipeline_mode<synchronous>, transform_indices = @transform_2, window_bounds = array<i64: 16, 64>}, {pipeline_mode = #tpu.pipeline_mode<synchronous>, transform_indices = @transform_3, window_bounds = array<i64: 1, 64>}, {transform_indices = @transform_4, window_bounds = array<i64: 16, 64>}]} {
    %c0 = arith.constant 0 : index
    %c0_0 = arith.constant 0 : index
    %0 = vector.load %arg2[%c0, %c0_0] : memref<16x16xf32, #tpu.memory_space<vmem>>, vector<16x16xf32>
    %c0_1 = arith.constant 0 : index
    %c0_2 = arith.constant 0 : index
    %1 = vector.load %arg3[%c0_1, %c0_2] : memref<16x16xf32, #tpu.memory_space<vmem>>, vector<16x16xf32>
    %cst = arith.constant dense<0.000000e+00> : vector<16x16xf32>
    %2 = tpu.matmul %0, %1, %cst {dimension_numbers = #tpu.dot_dimension_numbers<[1], [0], [0], [1], [0, 0, 1, 1], [], []>} : vector<16x16xf32>, vector<16x16xf32>, vector<16x16xf32> -> vector<16x16xf32>
    %c0_3 = arith.constant 0 : index
    %c0_4 = arith.constant 0 : index
    %3 = vector.load %arg4[%c0_3, %c0_4] : memref<16x64xf32, #tpu.memory_space<vmem>>, vector<16x64xf32>
    %cst_5 = arith.constant dense<0.000000e+00> : vector<16x64xf32>
    %4 = tpu.matmul %2, %3, %cst_5 {dimension_numbers = #tpu.dot_dimension_numbers<[1], [0], [0], [1], [0, 0, 1, 1], [], []>} : vector<16x16xf32>, vector<16x64xf32>, vector<16x64xf32> -> vector<16x64xf32>
    %c0_6 = arith.constant 0 : index
    %c0_7 = arith.constant 0 : index
    %5 = vector.load %arg5[%c0_6, %c0_7] : memref<1x64xf32, #tpu.memory_space<vmem>>, vector<1x64xf32>
    %6 = vector.broadcast %5 : vector<1x64xf32> to vector<16x64xf32>
    %7 = arith.addf %4, %6 : vector<16x64xf32>
    %cst_8 = arith.constant 0.000000e+00 : f32
    %8 = vector.broadcast %cst_8 : f32 to vector<16x64xf32>
    %9 = arith.maximumf %7, %8 : vector<16x64xf32>
    %c0_9 = arith.constant 0 : index
    %c0_10 = arith.constant 0 : index
    %10 = vector.load %arg6[%c0_9, %c0_10] : memref<16x64xf32, #tpu.memory_space<vmem>>, vector<16x64xf32>
    tpu.vector_store %arg6[%c0_9, %c0_10], %9 {strides = array<i32>} : memref<16x64xf32, #tpu.memory_space<vmem>>, vector<16x64xf32>,
    return
  }
  func.func @transform_0(%arg0: i32, %arg1: i32) -> (i32, i32) {
    %c0_i32 = arith.constant 0 : i32
    return %arg0, %arg1 : i32, i32
  }
  func.func @transform_1(%arg0: i32, %arg1: i32) -> (i32, i32) {
    %c0_i32 = arith.constant 0 : i32
    %c0_i32_0 = arith.constant 0 : i32
    return %arg1, %c0_i32 : i32, i32
  }
  func.func @transform_2(%arg0: i32, %arg1: i32) -> (i32, i32) {
    %c0_i32 = arith.constant 0 : i32
    %c0_i32_0 = arith.constant 0 : i32
    %c0_i32_1 = arith.constant 0 : i32
    return %c0_i32, %c0_i32_0 : i32, i32
  }
  func.func @transform_3(%arg0: i32, %arg1: i32) -> (i32, i32) {
    %c0_i32 = arith.constant 0 : i32
    %c0_i32_0 = arith.constant 0 : i32
    %c0_i32_1 = arith.constant 0 : i32
    return %c0_i32, %c0_i32_0 : i32, i32
  }
  func.func @transform_4(%arg0: i32, %arg1: i32) -> (i32, i32) {
    %c0_i32 = arith.constant 0 : i32
    %c0_i32_0 = arith.constant 0 : i32
    return %arg0, %c0_i32 : i32, i32
  }
}

</mosaic_0001>

<bundles_post_ra>
// kernel: tpu_custom_call.1
= control target key start
LH: loop header
LB: loop body
LE: loop exit
PB: predicated region body
PF: predicated region fallthrough
CT: control target
= control target key end

     0   :  { %9 = vsyncpa [#allocation3], 0  ;;  %s546_s0 = inlined_call_operand.hbm [shape: f32[16,16], index: 0, kind: input, shape index: {}]   ;;  %s547_s1 = inlined_call_operand.hbm [shape: f32[16,16], index: 1, kind: input, shape index: {}]   ;;  %s548_s2 = inlined_call_operand.hbm [shape: f32[16,64], index: 2, kind: input, shape index: {}]   ;;  %s549_s3 = inlined_call_operand.hbm [shape: f32[1,64], index: 3, kind: input, shape index: {}]   ;;  %s550_s4 = inlined_call_operand.hbm [shape: f32[16,64], index: 4, kind: output, shape index: {}]  }
   0x1   :  { %10 = vsyncpa [#allocation6], 0 }
   0x2   :  { %11 = vsyncpa [#allocation9], 0 }
   0x3   :  { %12 = vsyncpa [#allocation4], 0  ;;  %s431_s15 = smov [#allocation5]   ;;  %s432_s17 = smov [#allocation2]  }
   0x4   :  { %s30_s16 = sshll.u32 %s431_s15, 4  ;;  %s18_s18 = sshll.u32 %s432_s17, 4  ;;  %s31_s16 = int_to_ptr.vmem [resolvable:$true] %s30_s16  ;;  %s463_s18 = int_to_ptr.vmem [resolvable:$true] %s18_s18 }
   0x5   :  { %s313_s21 = scalar_lea.hbm %s547_s1, 256 }
   0x6   :  { %p314_p0 = scmp.ne.s32.totalorder %s547_s1, %s313_s21  ;;  %p317_p1 = scmp.lt.u32.totalorder %s313_s21, %s547_s1 }
   0x8   :  { %p319_p2 = pnand %p317_p1, %p314_p0 }
   0xa   :  { %322 = shalt.err (!%p319_p2)
}
   0xb   :  { %s323_s26 = scalar_lea.vmem %s31_s16, 256  ;;  %p328_p4 = scmp.lt.s32.totalorder %s31_s16, %s31_s16 }
   0xc   :  { %p324_p3 = scmp.ne.s32.totalorder %s31_s16, %s323_s26  ;;  %p329_p5 = scmp.lt.s32.totalorder %s323_s26, %s323_s26 }
   0xe   :  { %p330_p6 = por %p329_p5, %p328_p4 }
  0x10   :  { %p331_p7 = pnand %p330_p6, %p324_p3 }
  0x12   :  { %334 = shalt.err (!%p331_p7)
}
  0x13   :  { %s433_s27 = smov 128   ;;  %s434_s28 = smov 8  }
  0x14   :  { %36 = dma.hbm_to_vmem [thread:$0]  %s547_s1, 256, %s31_s16, [#allocation6], %s433_s27, %s433_s27, %s434_s28  }
  0x15   :  { %s335_s7 = scalar_lea.hbm %s546_s0, 256 }
  0x16   :  { %p336_p8 = scmp.ne.s32.totalorder %s546_s0, %s335_s7  ;;  %p339_p9 = scmp.lt.u32.totalorder %s335_s7, %s546_s0 }
  0x18   :  { %p341_p10 = pnand %p339_p9, %p336_p8 }
  0x1a   :  { %344 = shalt.err (!%p341_p10)
}
  0x1b   :  { %s345_s12 = scalar_lea.vmem %s463_s18, 256  ;;  %p350_p12 = scmp.lt.s32.totalorder %s463_s18, %s463_s18 }
  0x1c   :  { %p346_p11 = scmp.ne.s32.totalorder %s463_s18, %s345_s12  ;;  %p351_p13 = scmp.lt.s32.totalorder %s345_s12, %s345_s12 }
  0x1e   :  { %p352_p0 = por %p351_p13, %p350_p12 }
  0x20   :  { %p353_p1 = pnand %p352_p0, %p346_p11 }
  0x22   :  { %356 = shalt.err (!%p353_p1)
}
  0x23   :  { %24 = dma.hbm_to_vmem [thread:$0]  %s546_s0, 256, %s463_s18, [#allocation3], %s433_s27, %s433_s27, %s434_s28  }
  0x24   :  { %s435_s14 = smov [#allocation7]   ;;  %s436_s16 = smov [#allocation8]  }
  0x25   :  { %s42_s15 = sshll.u32 %s435_s14, 4  ;;  %s55_s17 = sshll.u32 %s436_s16, 4  ;;  %s43_s15 = int_to_ptr.vmem [resolvable:$true] %s42_s15  ;;  %s56_s17 = int_to_ptr.vmem [resolvable:$true] %s55_s17 }
  0x26   :  { %s357_s21 = scalar_lea.hbm %s548_s2, 256 }
  0x27   :  { %p358_p2 = scmp.ne.s32.totalorder %s548_s2, %s357_s21  ;;  %p361_p3 = scmp.lt.u32.totalorder %s357_s21, %s548_s2 }
  0x29   :  { %p363_p4 = pnand %p361_p3, %p358_p2 }
  0x2b   :  { %366 = shalt.err (!%p363_p4)
}
  0x2c   :  { %s367_s0 = scalar_lea.vmem %s43_s15, 256  ;;  %p372_p6 = scmp.lt.s32.totalorder %s43_s15, %s43_s15 }
  0x2d   :  { %p368_p5 = scmp.ne.s32.totalorder %s43_s15, %s367_s0  ;;  %p373_p7 = scmp.lt.s32.totalorder %s367_s0, %s367_s0 }
  0x2f   :  { %p374_p8 = por %p373_p7, %p372_p6 }
  0x31   :  { %p375_p9 = pnand %p374_p8, %p368_p5 }
  0x33   :  { %378 = shalt.err (!%p375_p9)
}
  0x34   :  { %48 = dma.hbm_to_vmem [thread:$0]  %s548_s2, 256, %s43_s15, [#allocation6], %s433_s27, %s433_s27, %s434_s28  }
  0x35   :  { %s379_s5 = scalar_lea.hbm %s549_s3, 16 }
  0x36   :  { %p380_p10 = scmp.ne.s32.totalorder %s549_s3, %s379_s5  ;;  %p383_p11 = scmp.lt.u32.totalorder %s379_s5, %s549_s3 }
  0x38   :  { %p385_p12 = pnand %p383_p11, %p380_p10 }
  0x3a   :  { %388 = shalt.err (!%p385_p12)
}
  0x3b   :  { %s389_s10 = scalar_lea.vmem %s56_s17, 16  ;;  %s393_s11 = scalar_lea.vmem %s56_s17, 32 }
  0x3c   :  { %p390_p13 = scmp.ne.s32.totalorder %s56_s17, %s389_s10  ;;  %p394_p0 = scmp.lt.s32.totalorder %s56_s17, %s56_s17 }
  0x3d   :  { %p395_p1 = scmp.lt.s32.totalorder %s393_s11, %s389_s10 }
  0x3f   :  { %p396_p2 = por %p395_p1, %p394_p0 }
  0x41   :  { %p397_p3 = pnand %p396_p2, %p390_p13 }
  0x43   :  { %400 = shalt.err (!%p397_p3)
}
  0x44   :  { %58 = dma.hbm_to_vmem [thread:$0]  %s549_s3, 16, %s56_s17, [#allocation9]  }
  0x45   :  { %423 = dma.done.wait [#allocation3], 256  }
  0x46   :  { %424 = vsyncadd [#allocation3], 4294967040 }
  0x47   :  { %425 = dma.done.wait [#allocation6], 512  }
  0x48   :  { %426 = vsyncadd [#allocation6], 4294966784 }
  0x49   :  { %427 = dma.done.wait [#allocation9], 16  }
  0x4a   :  { %428 = vsyncadd [#allocation9], 4294967280  ;;  %vm75_vm0 = vcmask 130048   ;;  %v73_v0 = vld [vmem:[#allocation5] sm:$0xff]  ;;  %v74_v1 = vld [vmem:[#allocation5 + $0x8] sm:$0xff]  ;;  %s437_s3 = smov [#allocation10]  }
  0x4b   :  { %v71_v2 = vld [vmem:[#allocation2] sm:$0xff]  ;;  %v298_v3 = vpack.c.bf16 %v74_v1, %v73_v0  ;;  %v158_v5 = vld [vmem:[#allocation7 + $0x8] sm:$0xff]  ;;  %v273_v10 = vld [vmem:[#allocation8] ss:$0 sm:$0xff]  ;;  %s257_s1 = sshll.u32 %s437_s3, 4  ;;  %vm249_vm1 = vcmask 523264   ;;  %s258_s1 = int_to_ptr.vmem [resolvable:$true] %s257_s1 }
  0x4c   :  { %288 = vmatprep.mubr.msk.f32.mxu0 %vm75_vm0, %v71_v2  ;;  %v157_v4 = vld [vmem:[#allocation7] sm:$0xff]  ;;  %v72_v7 = vld [vmem:[#allocation2 + $0x8] sm:$0xff]  ;;  %s401_s13 = scalar_lea.vmem %s258_s1, 256  ;;  %p406_p5 = scmp.lt.s32.totalorder %s258_s1, %s258_s1 }
  0x4d   :  { %v302_v6 = vpack.c.bf16 %v158_v5, %v157_v4  ;;  %299 = vmatprep.subr.bf16.mxu0 %v298_v3  ;;  %p402_p4 = scmp.ne.s32.totalorder %s258_s1, %s401_s13  ;;  %p407_p6 = scmp.lt.s32.totalorder %s401_s13, %s401_s13 }
  0x4e   :  { %301 = vmatpush3.bf16.msra.mxu0 %v298_v3 }
  0x4f   :  { %303 = vmatprep.subr.bf16.mxu1 %v302_v6  ;;  %p408_p7 = por %p407_p6, %p406_p5 }
  0x50   :  { %305 = vmatpush3.bf16.msra.mxu1 %v302_v6 }
  0x51   :  { %289 = vmatmul.mubr.msk.f32.vlgmr.msra.gmra.mrb[0].mxu0 %vm75_vm0, %v72_v7  ;;  %p409_p8 = pnand %p408_p7, %p402_p4 }
 0x124   :  { %v290_v8 = vpop.f32.mrb[0].mxu0 }
 0x125   :  { %v148_v9 = vpop.f32.mrb[1].mxu0 }
 0x126   :  { %295 = vmatprep.mubr.msk.f32.mxu1 %vm75_vm0, %v148_v9 }
 0x127   :  { %296 = vmatmul.mubr.msk.f32.vlgmr.msra.gmra.mrb[0].mxu1 %vm75_vm0, %v290_v8 }
 0x1fa   :  { %v297_v11 = vpop.f32.mrb[0].mxu1 }
 0x1fb   :  { %v244_v12 = vadd.f32 %v297_v11, %v273_v10  ;;  %v238_v13 = vpop.f32.mrb[1].mxu1 }
 0x1fc   :  { %v239_v14 = vadd.f32 %v273_v10, %v238_v13 }
 0x1fd   :  { %v248_v15 = vmax.f32 %v244_v12, 0.0 }
 0x1fe   :  { %v247_v16 = vmax.f32 %v239_v14, 0.0 }
 0x1ff   :  { %251 = vst.msk [vmem:[#allocation10 + $0x8] sm:$0xff] %vm249_vm1, %v248_v15 }
 0x200   :  { %250 = vst.msk [vmem:[#allocation10] sm:$0xff] %vm249_vm1, %v247_v16 }
 0x201   :  { %412 = shalt.err (!%p409_p8)
}
 0x202   :  { %s413_s16 = scalar_lea.hbm %s550_s4, 256 }
 0x203   :  { %p414_p9 = scmp.ne.s32.totalorder %s550_s4, %s413_s16  ;;  %p417_p10 = scmp.lt.u32.totalorder %s413_s16, %s550_s4 }
 0x205   :  { %p419_p11 = pnand %p417_p10, %p414_p9 }
 0x207   :  { %422 = shalt.err (!%p419_p11)
}
 0x208   :  { %263 = dma.vmem_to_hbm [thread:$0]  %s258_s1, 256, %s550_s4, [#allocation4], %s433_s27, %s433_s27, %s434_s28  }
 0x209   :  { %429 = dma.done.wait [#allocation4], 256  }
 0x20a   :  { %430 = vsyncadd [#allocation4], 4294967040 }
 0x20b   :  { %267 = vsyncpa [#allocation3], 1 }
 0x20c   :  { %268 = vsyncpa [#allocation6], 1 }
 0x20d   :  { %269 = vsyncpa [#allocation9], 1 }
 0x20e   :  { %270 = vsyncpa [#allocation4], 1 }

</bundles_post_ra>
